<compile_context>
chip_gen: v7x
topology: tpu7x:2x2x1
jax: 0.10.0
libtpu: 0.0.40
codegen_flags: <defaults>
</compile_context>

<pallas_src>
import functools

import jax
import jax.numpy as jnp
from jax.experimental import pallas as pl
from jax.experimental.pallas import tpu as pltpu

F32 = jnp.float32
BF16 = jnp.bfloat16


# ------------------------------ tiling helpers ------------------------------

def _row_tile(m, max_tile=256):
    """Largest power-of-two row tile <= max_tile dividing m (full array if m small)."""
    if m <= max_tile:
        return m
    for t in (512, 256, 128, 64, 32, 16, 8):
        if t <= max_tile and m % t == 0:
            return t
    return m


def _flat2d(x):
    """Flatten to a lane-dense 2-D view (last dim a multiple of 128 when possible)."""
    total = int(x.size)
    for lanes in (1024, 512, 256, 128):
        if total % lanes == 0 and total // lanes >= 8:
            return x.reshape(total // lanes, lanes)
    for lanes in (1024, 512, 256, 128):
        if total % lanes == 0:
            return x.reshape(total // lanes, lanes)
    c = x.shape[-1]
    return x.reshape(total // c, c)


# ----------------------------- Pallas kernels -----------------------------

def _mm_kernel(a_ref, b_ref, scale_ref, bias_ref, o_ref, *, relu):
    """bf16 MXU matmul (f32 acc) with fused per-channel affine (+ReLU)."""
    acc = jnp.dot(a_ref[...], b_ref[...], preferred_element_type=jnp.float32)
    out = acc * scale_ref[...] + bias_ref[...]
    if relu:
        out = jnp.maximum(out, 0.0)
    o_ref[...] = out.astype(o_ref.dtype)


def matmul_fused(a, b, scale, bias, *, relu=False, out_dtype=BF16):
    """y = (a @ b) * scale + bias (+ReLU).  a, b are bf16; epilogue in f32."""
    M, K = a.shape
    Kb, N = b.shape
    assert K == Kb
    tm = _row_tile(M, 256)
    nbytes = int(M * K * a.dtype.itemsize + K * N * b.dtype.itemsize
                 + M * N * jnp.dtype(out_dtype).itemsize + 8 * N)
    return pl.pallas_call(
        functools.partial(_mm_kernel, relu=relu),
        out_shape=jax.ShapeDtypeStruct((M, N), out_dtype),
        grid=(M // tm,),
        in_specs=[pl.BlockSpec((tm, K), lambda i: (i, 0)),
                  pl.BlockSpec((K, N), lambda i: (0, 0)),
                  pl.BlockSpec((1, N), lambda i: (0, 0)),
                  pl.BlockSpec((1, N), lambda i: (0, 0))],
        out_specs=pl.BlockSpec((tm, N), lambda i: (i, 0)),
        compiler_params=pltpu.CompilerParams(dimension_semantics=("parallel",)),
        cost_estimate=pl.CostEstimate(flops=int(2 * M * K * N), transcendentals=0,
                                      bytes_accessed=nbytes),
    )(a, b, scale.reshape(1, N).astype(F32), bias.reshape(1, N).astype(F32))


def _conv3x3_kernel(*refs, relu, has_res, H, W):
    """Direct 3x3/stride-1 conv (tap-accumulating MXU matmuls) with fused epilogue.

    Epilogue: out = acc * scale + bias [+ residual * res_scale] [-> ReLU]
    Also emits a per-channel abs-max partial for the next activation quant.
    """
    it = iter(refs)
    x_ref = next(it)      # (1, H+2, W+2, Cin)  bf16 (pre-padded, already quantized)
    w_ref = next(it)      # (9, Cin, Cout)      bf16 integer levels
    scale_ref = next(it)  # (1, Cout)           f32  (w_scale folded in)
    bias_ref = next(it)   # (1, Cout)           f32
    res_ref = rscale_ref = None
    if has_res:
        res_ref = next(it)     # (1, H, W, Cout) bf16
        rscale_ref = next(it)  # (1, Cout)       f32
    o_ref = next(it)      # (1, H, W, Cout)     bf16
    amax_ref = next(it)   # (1, 1, Cout)        f32

    cin = x_ref.shape[-1]
    cout = o_ref.shape[-1]
    acc = None
    for t in range(9):
        di, dj = divmod(t, 3)
        xt = x_ref[:, di:di + H, dj:dj + W, :].reshape(H * W, cin)
        d = jnp.dot(xt, w_ref[t], preferred_element_type=jnp.float32)
        acc = d if acc is None else acc + d
    out = acc * scale_ref[...] + bias_ref[...]
    if has_res:
        out = out + res_ref[...].reshape(H * W, cout).astype(jnp.float32) * rscale_ref[...]
    if relu:
        out = jnp.maximum(out, 0.0)
    amax_ref[...] = jnp.max(jnp.abs(out), axis=0, keepdims=True).reshape(1, 1, cout)
    o_ref[...] = out.reshape(1, H, W, cout).astype(o_ref.dtype)


def conv3x3_fused(x, w_lvls, scale, bias, *, relu=False, residual=None, res_scale=None):
    """3x3 stride-1 pad-1 conv on NHWC bf16; grid over batch (megacore-parallel)."""
    N, H, W, Cin = x.shape
    Cout = w_lvls.shape[-1]
    xpad = jnp.pad(x, ((0, 0), (1, 1), (1, 1), (0, 0)))   # XLA glue (cheap vs im2col)
    has_res = residual is not None

    args = [xpad, w_lvls,
            scale.reshape(1, Cout).astype(F32), bias.reshape(1, Cout).astype(F32)]
    in_specs = [pl.BlockSpec((1, H + 2, W + 2, Cin), lambda n: (n, 0, 0, 0)),
                pl.BlockSpec((9, Cin, Cout), lambda n: (0, 0, 0)),
                pl.BlockSpec((1, Cout), lambda n: (0, 0)),
                pl.BlockSpec((1, Cout), lambda n: (0, 0))]
    if has_res:
        args += [residual, res_scale.reshape(1, Cout).astype(F32)]
        in_specs += [pl.BlockSpec((1, H, W, Cout), lambda n: (n, 0, 0, 0)),
                     pl.BlockSpec((1, Cout), lambda n: (0, 0))]

    flops = int(2 * N * H * W * 9 * Cin * Cout)
    nbytes = int(xpad.size * 2 + w_lvls.size * 2
                 + N * H * W * Cout * 2 * (2 if has_res else 1) + N * Cout * 4)
    y, amax = pl.pallas_call(
        functools.partial(_conv3x3_kernel, relu=relu, has_res=has_res, H=H, W=W),
        out_shape=(jax.ShapeDtypeStruct((N, H, W, Cout), BF16),
                   jax.ShapeDtypeStruct((N, 1, Cout), F32)),
        grid=(N,),
        in_specs=in_specs,
        out_specs=(pl.BlockSpec((1, H, W, Cout), lambda n: (n, 0, 0, 0)),
                   pl.BlockSpec((1, 1, Cout), lambda n: (n, 0, 0))),
        compiler_params=pltpu.CompilerParams(dimension_semantics=("parallel",)),
        cost_estimate=pl.CostEstimate(flops=flops, transcendentals=0,
                                      bytes_accessed=nbytes),
    )(*args)
    return y, jnp.max(amax)          # tiny (N, Cout) -> scalar reduce in XLA


def _absmax_kernel(x_ref, o_ref):
    a = jnp.abs(x_ref[...].astype(jnp.float32))
    o_ref[...] = jnp.max(a, axis=0, keepdims=True).reshape(1, 1, a.shape[-1])


def pallas_absmax(x):
    """Per-tensor abs-max: sublane-only reduce per tile to lane-dense partials,
    final (tiny) cross-lane/step max done in XLA."""
    x2 = _flat2d(x)
    M, C = x2.shape
    tm = _row_tile(M, 512)
    g = M // tm
    part = pl.pallas_call(
        _absmax_kernel,
        out_shape=jax.ShapeDtypeStruct((g, 1, C), F32),
        grid=(g,),
        in_specs=[pl.BlockSpec((tm, C), lambda i: (i, 0))],
        out_specs=pl.BlockSpec((1, 1, C), lambda i: (i, 0, 0)),
        compiler_params=pltpu.CompilerParams(dimension_semantics=("parallel",)),
    )(x2)
    return jnp.max(part)


def _fq_kernel(x_ref, si_ref, o_ref, *, qmax, dequant):
    inv = si_ref[1]
    q = jnp.clip(jnp.round(x_ref[...].astype(jnp.float32) * inv), -qmax, qmax)
    if dequant:
        q = q * si_ref[0]
    o_ref[...] = q.astype(o_ref.dtype)


def fake_quant_apply(x2d, s, inv, qmax, *, dequant=True, out_dtype=BF16):
    """Symmetric per-tensor fake quant (row-tiled); scale/inv live in SMEM."""
    M, C = x2d.shape
    tm = _row_tile(M, 512)
    si = jnp.stack([jnp.asarray(s, F32).reshape(()), jnp.asarray(inv, F32).reshape(())])
    return pl.pallas_call(
        functools.partial(_fq_kernel, qmax=qmax, dequant=dequant),
        out_shape=jax.ShapeDtypeStruct((M, C), out_dtype),
        grid=(M // tm,),
        in_specs=[pl.BlockSpec((tm, C), lambda i: (i, 0)),
                  pl.BlockSpec(memory_space=pltpu.MemorySpace.SMEM)],
        out_specs=pl.BlockSpec((tm, C), lambda i: (i, 0)),
        compiler_params=pltpu.CompilerParams(dimension_semantics=("parallel",)),
    )(x2d, si)


def _max_mid_kernel(x_ref, o_ref):
    o_ref[...] = jnp.max(x_ref[...], axis=1)


def max_over_mid(x3d):
    """max-reduce over axis 1 of an (M, HW, C) array (AdaptiveMaxPool2d(1))."""
    M, Wd, C = x3d.shape
    tc = 128 if C % 128 == 0 else C
    return pl.pallas_call(
        _max_mid_kernel,
        out_shape=jax.ShapeDtypeStruct((M, C), x3d.dtype),
        grid=(C // tc,),
        in_specs=[pl.BlockSpec((M, Wd, tc), lambda i: (0, 0, i))],
        out_specs=pl.BlockSpec((M, tc), lambda i: (0, i)),
        compiler_params=pltpu.CompilerParams(dimension_semantics=("parallel",)),
    )(x3d)


# ------------------------------ quant helpers -------------------------------

def act_scale_from_amax(amax, bits):
    qmax = float(2 ** (bits - 1) - 1)
    s = (amax / qmax).astype(F32)
    inv = jnp.where(amax > 0.0, qmax / amax, 0.0).astype(F32)
    return s, inv, qmax


def quant_weight_levels(w, bits):
    """Per-tensor weight quant -> integer levels (exact in bf16) + scalar scale."""
    qmax = float(2 ** (bits - 1) - 1)
    amax = pallas_absmax(w)
    scale = (amax / qmax).astype(F32)
    inv = jnp.where(amax > 0.0, qmax / amax, 0.0).astype(F32)
    lvls = fake_quant_apply(_flat2d(w), scale, inv, qmax, dequant=False, out_dtype=BF16)
    return lvls.reshape(w.shape), scale


# ------------------------------ conv glue -----------------------------------

def im2col(x, kh, kw, stride, pad):
    """NHWC -> (N*OH*OW, kh*kw*C) patches.  Only used for the one-time 7x7 stem."""
    N, H, W, C = x.shape
    xp = jnp.pad(x, ((0, 0), (pad, pad), (pad, pad), (0, 0)))
    OH = (H + 2 * pad - kh) // stride + 1
    OW = (W + 2 * pad - kw) // stride + 1
    cols = [xp[:, i:i + stride * OH:stride, j:j + stride * OW:stride, :]
            for i in range(kh) for j in range(kw)]
    patches = jnp.concatenate(cols, axis=-1)
    return patches.reshape(N * OH * OW, kh * kw * C), (N, OH, OW)


# ------------------------------ model forward ------------------------------

def qblock(x, amax_x, bp, bit_a):
    """Quantized basic block: act-quant -> conv3x3+BN+ReLU -> act-quant -> conv3x3
    (+shortcut), with the stage BatchNorm2d fused into conv2's epilogue."""
    N, H, W, Cin = x.shape
    Cout = bp["w1"].shape[-1]

    s_in, inv_in, qmax_in = act_scale_from_amax(amax_x, bp["a_bits"])
    xq = fake_quant_apply(x.reshape(N * H * W, Cin), s_in, inv_in, qmax_in
                          ).reshape(N, H, W, Cin)

    if bp["w_sc"] is not None:
        # 1x1 projection shortcut on the quantized input (pure matmul, no im2col).
        sc = matmul_fused(xq.reshape(N * H * W, Cin), bp["w_sc"],
                          bp["sc_scale"], bp["sc_bias"]).reshape(N, H, W, Cout)
    else:
        sc = xq

    h, amax_h = conv3x3_fused(xq, bp["w1"], bp["s1"], bp["b1"], relu=True)

    s_mid, inv_mid, qmax_mid = act_scale_from_amax(amax_h, bit_a)
    hq = fake_quant_apply(h.reshape(N * H * W, Cout), s_mid, inv_mid, qmax_mid
                          ).reshape(N, H, W, Cout)

    # TODO(synk): assumed shortcut-add then stage BatchNorm2d, no post-add ReLU
    # (QBasicBlock definition not provided in the reference snippet).
    out, amax_out = conv3x3_fused(hq, bp["w2"], bp["s_out"], bp["b_out"],
                                  residual=sc, res_scale=bp["res_scale"])
    return out, amax_out


def qresnet_forward(x_nchw, prep, bit_a=8):
    x = jnp.transpose(x_nchw, (0, 2, 3, 1)).astype(BF16)        # NCHW -> NHWC bf16

    # stem: QConv2d(3, 64, 7, stride=2, pad=3) + BN (fused) + MaxPool2d(2, 2)
    st = prep["stem"]
    patches, (N, OH, OW) = im2col(x, 7, 7, 2, 3)
    x = matmul_fused(patches, st["w"], st["scale"], st["bias"]
                     ).reshape(N, OH, OW, st["w"].shape[-1])
    # MaxPool2d(2, 2): elementwise max of four strided NHWC slices (no transpose).
    x = jnp.maximum(jnp.maximum(x[:, 0::2, 0::2, :], x[:, 0::2, 1::2, :]),
                    jnp.maximum(x[:, 1::2, 0::2, :], x[:, 1::2, 1::2, :]))
    amax_x = pallas_absmax(x)

    # residual stages: [act-quant, res_blk, BatchNorm2d] per block (BN fused in block)
    for stage in prep["stages"]:
        for blk in stage:
            x, amax_x = qblock(x, amax_x, blk, bit_a)

    # head: AdaptiveMaxPool2d(1) -> act-quant(8) -> QLinear -> BatchNorm1d (fused)
    N, H, W, C = x.shape
    pooled = max_over_mid(x.reshape(N, H * W, C))                # (N, C) bf16
    s, inv, qmax = act_scale_from_amax(pallas_absmax(pooled), 8)
    pooled_q = fake_quant_apply(pooled, s, inv, qmax)
    hd = prep["head"]
    return matmul_fused(pooled_q, hd["w"], hd["scale"], hd["bias"], out_dtype=F32)


# --------------------------- parameter preparation ---------------------------

def bn_fold(bn):
    scale = bn["gamma"] / jnp.sqrt(bn["var"] + 1e-5)
    bias = bn["beta"] - bn["mean"] * scale
    c = scale.shape[0]
    return scale.reshape(1, c).astype(F32), bias.reshape(1, c).astype(F32)


def prepare_params(params, bit_w=8):
    """One-time prep (hoisted out of the forward): per-tensor weight quant to bf16
    integer levels (Pallas), reshape to matmul/conv layout, fold BN + weight scale."""
    def prep_conv3x3(w, bits):
        kh, kw, cin, cout = w.shape
        lvls, ws = quant_weight_levels(w, bits)
        return lvls.reshape(kh * kw, cin, cout), ws

    def prep_mm(w, bits):
        lvls, ws = quant_weight_levels(w, bits)
        return lvls.reshape(-1, w.shape[-1]), ws

    sw, s_stem = prep_mm(params["stem_w"], 8)
    bs, bb = bn_fold(params["stem_bn"])
    prep = {"stem": {"w": sw, "scale": bs * s_stem, "bias": bb}}

    stages = []
    for stage in params["stages"]:
        pstage = []
        for blk in stage:
            cout = blk["w1"].shape[3]
            w1, s_w1 = prep_conv3x3(blk["w1"], bit_w)
            w2, s_w2 = prep_conv3x3(blk["w2"], bit_w)
            s1, b1 = bn_fold(blk["bn1"])
            so, bo = bn_fold(blk["bn_out"])
            pb = {"a_bits": blk["a_bits"],
                  "w1": w1, "s1": s1 * s_w1, "b1": b1,
                  "w2": w2, "s_out": so * s_w2, "b_out": bo, "res_scale": so,
                  "w_sc": None, "sc_scale": None, "sc_bias": None}
            if "w_sc" in blk:
                wsc, s_wsc = prep_mm(blk["w_sc"], bit_w)
                pb["w_sc"] = wsc
                pb["sc_scale"] = jnp.full((1, cout), 1.0, F32) * s_wsc
                pb["sc_bias"] = jnp.zeros((1, cout), F32)
            pstage.append(pb)
        stages.append(pstage)
    prep["stages"] = stages

    hw, s_head = prep_mm(params["head_w"], 8)
    hs, hb = bn_fold(params["head_bn"])
    prep["head"] = {"w": hw, "scale": hs * s_head, "bias": hb}
    return prep


# --------------------------- deterministic raw params ---------------------------

def init_params(key, second_layer_channel=32, blk_nums=(1, 1, 1, 1), out_dim=8, bit_a=8):
    keys = iter(jax.random.split(key, 256))

    def conv_w(kh, kw, cin, cout):
        fan_in = float(kh * kw * cin)
        return jax.random.normal(next(keys), (kh, kw, cin, cout), F32) / jnp.sqrt(fan_in)

    def bn(c):
        return {"gamma": 1.0 + 0.1 * jax.random.normal(next(keys), (c,), F32),
                "beta": 0.1 * jax.random.normal(next(keys), (c,), F32),
                "mean": jnp.zeros((c,), F32),
                "var": jnp.ones((c,), F32)}

    params = {"stem_w": conv_w(7, 7, 3, 64), "stem_bn": bn(64)}
    stages = []
    in_c = 64
    for i in range(4):
        out_c = second_layer_channel * (2 ** i)
        stage = []
        for bidx in range(blk_nums[i]):
            blk_in = in_c if bidx == 0 else out_c
            blk = {
                "a_bits": 8 if (i == 0 and bidx == 0) else bit_a,  # IF_8BIT_FIRST_LAST
                "w1": conv_w(3, 3, blk_in, out_c),
                "bn1": bn(out_c),
                "w2": conv_w(3, 3, out_c, out_c),
                "bn_out": bn(out_c),
            }
            if blk_in != out_c:
                blk["w_sc"] = conv_w(1, 1, blk_in, out_c)
            stage.append(blk)
        stages.append(stage)
        in_c = out_c
    params["stages"] = stages
    params["head_w"] = jax.random.normal(next(keys), (in_c, out_dim), F32) / jnp.sqrt(float(in_c))
    params["head_bn"] = bn(out_dim)
    return params


# ----------------------------------- main -----------------------------------

if __name__ == "__main__":
    root = jax.random.PRNGKey(0)
    k_params, k_input = jax.random.split(root)
    raw = init_params(k_params, second_layer_channel=32, blk_nums=(1, 1, 1, 1), out_dim=8)
    prep = prepare_params(raw, bit_w=8)       # weight quant hoisted out of the forward
    x = jax.random.normal(k_input, (2, 3, 32, 32), F32)          # NCHW input

    fwd = jax.jit(lambda inp: qresnet_forward(inp, prep))
    out = fwd(x)
    jax.block_until_ready(out)
    assert out.shape == (2, 8) and out.dtype == jnp.float32
    print("KERNEL_OK")
</pallas_src>

<mosaic_0001>
module attributes {stable_mosaic.version = 11 : i64} {
  func.func @_absmax_kernel(%arg0: i32, %arg1: memref<147x64xf32, #tpu.memory_space<vmem>>, %arg2: memref<1x1x64xf32, #tpu.memory_space<vmem>>) attributes {dimension_semantics = [#tpu.dimension_semantics<parallel>], iteration_bounds = array<i64: 1>, scalar_prefetch = 0 : i64, scratch_operands = 0 : i64, tpu.core_type = #tpu.core_type<tc>, window_params = [{transform_indices = @transform_0, window_bounds = array<i64: 147, 64>}, {transform_indices = @transform_1, window_bounds = array<i64: 1, 1, 64>}]} {
    %c0 = arith.constant 0 : index
    %c0_0 = arith.constant 0 : index
    %0 = vector.load %arg1[%c0, %c0_0] : memref<147x64xf32, #tpu.memory_space<vmem>>, vector<147x64xf32>
    %1 = math.absf %0 : vector<147x64xf32>
    %cst = arith.constant dense<0xFF800000> : vector<64xf32>
    %2 = vector.multi_reduction <maximumf>, %1, %cst [0] : vector<147x64xf32> to vector<64xf32>
    %3 = vector.shape_cast %2 : vector<64xf32> to vector<1x64xf32>
    %4 = vector.shape_cast %3 : vector<1x64xf32> to vector<1x1x64xf32>
    %c0_1 = arith.constant 0 : index
    %c0_2 = arith.constant 0 : index
    %c0_3 = arith.constant 0 : index
    %5 = vector.load %arg2[%c0_1, %c0_2, %c0_3] : memref<1x1x64xf32, #tpu.memory_space<vmem>>, vector<1x1x64xf32>
    tpu.vector_store %arg2[%c0_1, %c0_2, %c0_3], %4 {strides = array<i32>} : memref<1x1x64xf32, #tpu.memory_space<vmem>>, vector<1x1x64xf32>,
    return
  }
  func.func @transform_0(%arg0: i32) -> (i32, i32) {
    %c0_i32 = arith.constant 0 : i32
    %c0_i32_0 = arith.constant 0 : i32
    return %arg0, %c0_i32 : i32, i32
  }
  func.func @transform_1(%arg0: i32) -> (i32, i32, i32) {
    %c0_i32 = arith.constant 0 : i32
    %c0_i32_0 = arith.constant 0 : i32
    %c0_i32_1 = arith.constant 0 : i32
    return %arg0, %c0_i32, %c0_i32_0 : i32, i32, i32
  }
}

</mosaic_0001>

<bundles_post_ra>
// kernel: tpu_custom_call.1
= control target key start
LH: loop header
LB: loop body
LE: loop exit
PB: predicated region body
PF: predicated region fallthrough
CT: control target
= control target key end

     0   :  { %vm47_vm0 = vcmask 523264   ;;  %vm80_vm1 = vcmask 518144   ;;  %s232_s0 = inlined_call_operand.vmem [shape: f32[147,64], index: 0, kind: input, shape index: {}]   ;;  %s233_s1 = inlined_call_operand.hbm [shape: f32[1,1,64], index: 1, kind: output, shape index: {}]  }
   0x1   :  { %v9_v0 = vld [vmem:[%s232_s0] sm:$0xff]  ;;  %v10_v1 = vld [vmem:[%s232_s0 + $0x8] sm:$0xff]  ;;  %v11_v2 = vld [vmem:[%s232_s0 + $0x10] sm:$0xff] }
   0x2   :  { %v12_v3 = vld [vmem:[%s232_s0 + $0x18] sm:$0xff]  ;;  %v13_v4 = vld [vmem:[%s232_s0 + $0x20] sm:$0xff]  ;;  %v14_v5 = vld [vmem:[%s232_s0 + $0x28] sm:$0xff]  ;;  %v28_v6 = vand.u32 2147483647, %v9_v0 }
   0x3   :  { %v15_v7 = vld [vmem:[%s232_s0 + $0x30] sm:$0xff]  ;;  %v16_v8 = vld [vmem:[%s232_s0 + $0x38] sm:$0xff]  ;;  %v17_v9 = vld [vmem:[%s232_s0 + $0x40] sm:$0xff]  ;;  %v29_v10 = vand.u32 2147483647, %v10_v1 }
   0x4   :  { %v18_v11 = vld [vmem:[%s232_s0 + $0x48] sm:$0xff]  ;;  %v19_v12 = vld [vmem:[%s232_s0 + $0x50] sm:$0xff]  ;;  %v20_v13 = vld [vmem:[%s232_s0 + $0x58] sm:$0xff]  ;;  %v30_v14 = vand.u32 2147483647, %v11_v2  ;;  %v48_v15 = vsel %vm47_vm0, %v28_v6, -inf }
   0x5   :  { %v21_v16 = vld [vmem:[%s232_s0 + $0x60] sm:$0xff]  ;;  %v22_v17 = vld [vmem:[%s232_s0 + $0x68] sm:$0xff]  ;;  %v23_v18 = vld [vmem:[%s232_s0 + $0x70] sm:$0xff]  ;;  %v31_v19 = vand.u32 2147483647, %v12_v3  ;;  %v49_v20 = vsel %vm47_vm0, %v29_v10, -inf }
   0x6   :  { %v24_v21 = vld [vmem:[%s232_s0 + $0x78] sm:$0xff]  ;;  %v25_v22 = vld [vmem:[%s232_s0 + $0x80] sm:$0xff]  ;;  %v26_v23 = vld [vmem:[%s232_s0 + $0x88] sm:$0xff]  ;;  %v32_v24 = vand.u32 2147483647, %v13_v4  ;;  %v50_v25 = vsel %vm47_vm0, %v30_v14, -inf }
   0x7   :  { %v27_v26 = vld [vmem:[%s232_s0 + $0x90] sm:$0x7]  ;;  %v33_v27 = vand.u32 2147483647, %v14_v5  ;;  %v34_v28 = vand.u32 2147483647, %v15_v7 }
   0x8   :  { %v35_v29 = vand.u32 2147483647, %v16_v8  ;;  %v36_v30 = vand.u32 2147483647, %v17_v9  ;;  %v37_v31 = vand.u32 2147483647, %v18_v11 }
   0x9   :  { %v38_v32 = vand.u32 2147483647, %v19_v12  ;;  %v39_v33 = vand.u32 2147483647, %v20_v13  ;;  %v40_v34 = vand.u32 2147483647, %v21_v16 }
   0xa   :  { %v41_v35 = vand.u32 2147483647, %v22_v17  ;;  %v42_v36 = vand.u32 2147483647, %v23_v18  ;;  %v43_v37 = vand.u32 2147483647, %v24_v21 }
   0xb   :  { %v44_v38 = vand.u32 2147483647, %v25_v22  ;;  %v45_v39 = vand.u32 2147483647, %v26_v23  ;;  %v46_v40 = vand.u32 2147483647, %v27_v26 }
   0xc   :  { %v51_v41 = vsel %vm47_vm0, %v31_v19, -inf  ;;  %v52_v42 = vsel %vm47_vm0, %v32_v24, -inf  ;;  %v54_v43 = vsel %vm47_vm0, %v33_v27, -inf  ;;  %v56_v44 = vsel %vm47_vm0, %v34_v28, -inf }
   0xd   :  { %6 = vsyncpa [#allocation3], 0  ;;  %v53_v45 = vmax.f32 %v48_v15, %v52_v42  ;;  %v55_v46 = vmax.f32 %v49_v20, %v54_v43  ;;  %v57_v47 = vmax.f32 %v50_v25, %v56_v44  ;;  %v58_v48 = vsel %vm47_vm0, %v35_v29, -inf  ;;  %s133_s0 = smov [#allocation2]  }
   0xe   :  { %v59_v49 = vmax.f32 %v51_v41, %v58_v48  ;;  %v60_v50 = vsel %vm47_vm0, %v36_v30, -inf  ;;  %v62_v51 = vsel %vm47_vm0, %v37_v31, -inf  ;;  %v64_v52 = vsel %vm47_vm0, %v38_v32, -inf  ;;  %s100_s15 = sshll.u32 %s133_s0, 4  ;;  %s101_s15 = int_to_ptr.vmem [resolvable:$true] %s100_s15 }
   0xf   :  { %v61_v53 = vmax.f32 %v53_v45, %v60_v50  ;;  %v63_v54 = vmax.f32 %v55_v46, %v62_v51  ;;  %v65_v55 = vmax.f32 %v57_v47, %v64_v52  ;;  %v66_v56 = vsel %vm47_vm0, %v39_v33, -inf  ;;  %s109_s16 = scalar_lea.vmem %s101_s15, 16  ;;  %s113_s17 = scalar_lea.vmem %s101_s15, 32 }
  0x10   :  { %v67_v57 = vmax.f32 %v59_v49, %v66_v56  ;;  %v68_v58 = vsel %vm47_vm0, %v40_v34, -inf  ;;  %v70_v59 = vsel %vm47_vm0, %v41_v35, -inf  ;;  %v72_v60 = vsel %vm47_vm0, %v42_v36, -inf  ;;  %p110_p0 = scmp.ne.s32.totalorder %s101_s15, %s109_s16  ;;  %p114_p1 = scmp.lt.s32.totalorder %s101_s15, %s101_s15 }
  0x11   :  { %v69_v61 = vmax.f32 %v61_v53, %v68_v58  ;;  %v71_v62 = vmax.f32 %v63_v54, %v70_v59  ;;  %v73_v63 = vmax.f32 %v65_v55, %v72_v60  ;;  %v74_v0 = vsel %vm47_vm0, %v43_v37, -inf  ;;  %p115_p2 = scmp.lt.s32.totalorder %s113_s17, %s109_s16 }
  0x12   :  { %v75_v1 = vmax.f32 %v67_v57, %v74_v0  ;;  %v76_v2 = vsel %vm47_vm0, %v44_v38, -inf  ;;  %v78_v3 = vsel %vm47_vm0, %v45_v39, -inf  ;;  %v81_v4 = vsel %vm80_vm1, %v46_v40, -inf }
  0x13   :  { %v77_v5 = vmax.f32 %v69_v61, %v76_v2  ;;  %v79_v6 = vmax.f32 %v71_v62, %v78_v3  ;;  %v82_v7 = vmax.f32 %v73_v63, %v81_v4  ;;  %vm92_vm2 = vcmask 516096   ;;  %p116_p3 = por %p115_p2, %p114_p1 }
  0x15   :  { %v83_v8 = vmax.f32 %v77_v5, %v79_v6  ;;  %v84_v9 = vmax.f32 %v82_v7, %v75_v1  ;;  %p117_p4 = pnand %p116_p3, %p110_p0 }
  0x17   :  { %v85_v10 = vmax.f32 %v83_v8, %v84_v9 }
  0x19   :  { %v86_v11 = vrot.slane %v85_v10, 4 }
  0x1b   :  { %v87_v12 = vmax.f32 %v85_v10, %v86_v11 }
  0x1d   :  { %v88_v13 = vrot.slane %v87_v12, 2 }
  0x1f   :  { %v89_v14 = vmax.f32 %v87_v12, %v88_v13 }
  0x21   :  { %v90_v15 = vrot.slane %v89_v14, 1 }
  0x23   :  { %v91_v16 = vmax.f32 %v89_v14, %v90_v15 }
  0x25   :  { %93 = vst.msk [vmem:[#allocation2] sm:$0x1] %vm92_vm2, %v91_v16 }
  0x26   :  { %120 = shalt.err (!%p117_p4)
}
  0x27   :  { %s121_s20 = scalar_lea.hbm %s233_s1, 16 }
  0x28   :  { %p122_p5 = scmp.ne.s32.totalorder %s233_s1, %s121_s20  ;;  %p125_p6 = scmp.lt.u32.totalorder %s121_s20, %s233_s1 }
  0x2a   :  { %p127_p7 = pnand %p125_p6, %p122_p5 }
  0x2c   :  { %130 = shalt.err (!%p127_p7)
}
  0x2d   :  { %103 = dma.vmem_to_hbm [thread:$0]  %s101_s15, 16, %s233_s1, [#allocation3]  }
  0x2e   :  { %131 = dma.done.wait [#allocation3], 16  }
  0x2f   :  { %132 = vsyncadd [#allocation3], 4294967280 }
  0x30   :  { %107 = vsyncpa [#allocation3], 1 }

</bundles_post_ra>
